<compile_context>
chip_gen: v6e
topology: v6e:2x2x1
jax: 0.10.0
libtpu: 0.0.40
codegen_flags: <defaults>
</compile_context>

<pallas_src>
import functools

import jax
import jax.numpy as jnp
from jax import lax
from jax.experimental import pallas as pl
from jax.experimental.pallas import tpu as pltpu


def _round_up(x: int, m: int) -> int:
    return ((x + m - 1) // m) * m


def _sublane_multiple(dtype) -> int:
    # f32 -> 8, bf16 -> 16, int8/fp8 -> 32 (packed sublanes).
    return max(8, 32 // jnp.dtype(dtype).itemsize)


# ---------------------------------------------------------------------------
# Path A: table stays in HBM; per-row DMA gather with a bounded sliding
# window of in-flight copies landing directly in the output block.
# ---------------------------------------------------------------------------
def _dma_gather_kernel(idx_ref, table_ref, o_ref, sems, *, tb, window):
    """idx_ref: SMEM (n_pad,) int32; table_ref: HBM (V, D_pad);
    o_ref: VMEM (tb, D_pad) output block; sems: DMA sem ring (window,)."""
    step = pl.program_id(0)
    base = step * tb

    def _issue(t, slot, row):
        pltpu.make_async_copy(
            table_ref.at[pl.ds(row, 1), :],   # one embedding row in HBM
            o_ref.at[pl.ds(t, 1), :],         # straight into the output block
            sems.at[slot],
        ).start()

    def _wait(t, slot):
        # src slice is shape-only; the semaphore does the actual sync.
        pltpu.make_async_copy(
            table_ref.at[pl.ds(0, 1), :],
            o_ref.at[pl.ds(t, 1), :],
            sems.at[slot],
        ).wait()

    # Prime the window (small static loop, <= window issues).
    for t in range(min(window, tb)):
        _issue(t, t % window, idx_ref[base + t])

    # Steady state: wait on copy t, immediately refill its slot with t+window.
    if tb > window:
        def steady(t, _):
            nxt = t + window
            row = idx_ref[base + nxt]          # read index before the wait
            slot = lax.rem(t, window)
            _wait(t, slot)
            _issue(nxt, slot, row)
            return 0

        lax.fori_loop(0, tb - window, steady, 0)

    # Drain the remaining in-flight copies before the block is written back.
    def drain(t, _):
        _wait(t, lax.rem(t, window))
        return 0

    lax.fori_loop(max(0, tb - window), tb, drain, 0)


def _gather_chunk_dma(idx_pad, table, *, tb, window, out_dtype):
    n_pad = idx_pad.shape[0]
    _, d_pad = table.shape
    itemsize = jnp.dtype(out_dtype).itemsize
    kernel = functools.partial(_dma_gather_kernel, tb=tb, window=window)
    return pl.pallas_call(
        kernel,
        out_shape=jax.ShapeDtypeStruct((n_pad, d_pad), out_dtype),
        grid_spec=pltpu.PrefetchScalarGridSpec(
            num_scalar_prefetch=1,                         # idx -> SMEM
            grid=(n_pad // tb,),
            in_specs=[pl.BlockSpec(memory_space=pl.ANY)],  # table stays in HBM
            out_specs=pl.BlockSpec((tb, d_pad), lambda i, idx: (i, 0)),
            scratch_shapes=[pltpu.SemaphoreType.DMA((window,))],
        ),
        compiler_params=pltpu.CompilerParams(
            dimension_semantics=("parallel",),
            vmem_limit_bytes=32 * 1024 * 1024,
        ),
        cost_estimate=pl.CostEstimate(
            flops=0, transcendentals=0,
            bytes_accessed=int(2 * n_pad * d_pad * itemsize)),
    )(idx_pad, table)


# ---------------------------------------------------------------------------
# Path B: table resident in VMEM (loaded once via a constant-index BlockSpec);
# gather is an in-VMEM dynamic row copy per token.
# ---------------------------------------------------------------------------
def _resident_gather_kernel(idx_ref, table_ref, o_ref, *, tb):
    """idx_ref: SMEM (n_pad,) int32; table_ref: VMEM (V, D_pad) resident;
    o_ref: VMEM (tb, D_pad) output block."""
    step = pl.program_id(0)
    base = step * tb

    def body(t, _):
        row = idx_ref[base + t]
        o_ref[pl.ds(t, 1), :] = table_ref[pl.ds(row, 1), :]
        return 0

    lax.fori_loop(0, tb, body, 0)


def _gather_chunk_resident(idx_pad, table, *, tb, out_dtype):
    n_pad = idx_pad.shape[0]
    v, d_pad = table.shape
    itemsize = jnp.dtype(out_dtype).itemsize
    table_bytes = v * d_pad * itemsize
    vmem_limit = int(min(
        60 * 1024 * 1024,
        max(16 * 1024 * 1024,
            2 * table_bytes + 4 * tb * d_pad * itemsize + (4 << 20))))
    kernel = functools.partial(_resident_gather_kernel, tb=tb)
    return pl.pallas_call(
        kernel,
        out_shape=jax.ShapeDtypeStruct((n_pad, d_pad), out_dtype),
        grid_spec=pltpu.PrefetchScalarGridSpec(
            num_scalar_prefetch=1,                         # idx -> SMEM
            grid=(n_pad // tb,),
            in_specs=[pl.BlockSpec((v, d_pad), lambda i, idx: (0, 0))],
            out_specs=pl.BlockSpec((tb, d_pad), lambda i, idx: (i, 0)),
        ),
        compiler_params=pltpu.CompilerParams(
            dimension_semantics=("parallel",),
            vmem_limit_bytes=vmem_limit,
        ),
        cost_estimate=pl.CostEstimate(
            flops=0, transcendentals=0,
            bytes_accessed=int(table_bytes + 2 * n_pad * d_pad * itemsize)),
    )(idx_pad, table)


# ---------------------------------------------------------------------------
# Wrapper: forward pass of text_embedding_conceptizer.
# ---------------------------------------------------------------------------
def text_embedding_conceptizer_forward(x: jax.Array,
                                       embeddings: jax.Array,
                                       *,
                                       tokens_per_step: int = 256,
                                       window: int = 32,
                                       resident_table_max_bytes: int = 12 * 1024 * 1024,
                                       max_tokens_per_call: int = 32768,
                                       force_path: str | None = None) -> jax.Array:
    """x: (B, 1, L) int word indices; embeddings: (V, D). Returns (B, L, D)."""
    b, c, L = x.shape
    assert c == 1, "text_embedding_conceptizer expects input of shape (B, 1, L)"
    V, D = embeddings.shape
    out_dtype = embeddings.dtype
    itemsize = jnp.dtype(out_dtype).itemsize
    sub = _sublane_multiple(out_dtype)

    # Lane-dense layout: pad the embedding dim up to a multiple of 128.
    d_pad = _round_up(D, 128)
    table = embeddings if d_pad == D else jnp.pad(
        embeddings, ((0, 0), (0, d_pad - D)))

    idx = x.reshape(-1).astype(jnp.int32)
    n = idx.shape[0]

    table_bytes = V * d_pad * itemsize
    if force_path == "dma":
        resident = False
    elif force_path == "resident":
        resident = True
    else:
        resident = table_bytes <= resident_table_max_bytes

    # Token block per grid step: large (amortize ~0.35us/step), sublane-aligned
    # for this dtype, never larger than the padded token count.
    tb_full = max(sub, (tokens_per_step // sub) * sub)

    chunks = []
    for start in range(0, n, max_tokens_per_call):
        idx_c = idx[start:start + max_tokens_per_call]
        n_c = idx_c.shape[0]
        tb = min(tb_full, _round_up(n_c, sub))
        n_pad = _round_up(n_c, tb)
        if n_pad != n_c:
            idx_c = jnp.pad(idx_c, (0, n_pad - n_c))   # row 0 is always valid
        if resident:
            out_c = _gather_chunk_resident(idx_c, table, tb=tb,
                                           out_dtype=out_dtype)
        else:
            out_c = _gather_chunk_dma(idx_c, table, tb=tb,
                                      window=min(window, tb),
                                      out_dtype=out_dtype)
        chunks.append(out_c[:n_c] if n_pad != n_c else out_c)

    out = chunks[0] if len(chunks) == 1 else jnp.concatenate(chunks, axis=0)
    if d_pad != D:
        out = out[:, :D]
    return out.reshape(b, L, D)


if __name__ == "__main__":
    key = jax.random.PRNGKey(0)
    k_emb, k_idx = jax.random.split(key)

    # Small shapes consistent with the module: batch=2, seq=8, hidden=32.
    batch, seq, vocab, hidden = 2, 8, 50, 32

    embeddings = jax.random.normal(k_emb, (vocab, hidden), dtype=jnp.float32)
    x = jax.random.randint(k_idx, (batch, 1, seq), 0, vocab, dtype=jnp.int32)

    # Pure-JAX reference: embedding lookup of x.squeeze(1).
    expected = jnp.take(embeddings, x.reshape(batch, seq), axis=0)

    # Resident (VMEM table) fast path -- the one taken for this table size.
    h_res = jax.block_until_ready(
        text_embedding_conceptizer_forward(x, embeddings, force_path="resident"))
    # HBM DMA-gather path -- used automatically for large vocabularies.
    h_dma = jax.block_until_ready(
        text_embedding_conceptizer_forward(x, embeddings, force_path="dma"))

    for h in (h_res, h_dma):
        assert h.shape == (batch, seq, hidden), h.shape
        assert h.dtype == embeddings.dtype, h.dtype
        assert bool(jnp.allclose(h, expected)), "embedding gather mismatch"

    print("KERNEL_OK")
</pallas_src>

<mosaic_0001>
module attributes {stable_mosaic.version = 11 : i64} {
  func.func @_resident_gather_kernel(%arg0: i32, %arg1: memref<16xi32, #tpu.memory_space<smem>>, %arg2: memref<50x128xf32, #tpu.memory_space<vmem>>, %arg3: memref<16x128xf32, #tpu.memory_space<vmem>>) attributes {dimension_semantics = [#tpu.dimension_semantics<parallel>], iteration_bounds = array<i64: 1>, scalar_prefetch = 1 : i64, scratch_operands = 0 : i64, tpu.core_type = #tpu.core_type<tc>, window_params = [{pipeline_mode = #tpu.pipeline_mode<synchronous>, transform_indices = @transform_0, window_bounds = array<i64: 50, 128>}, {transform_indices = @transform_1, window_bounds = array<i64: 16, 128>}]} {
    %c16_i32 = arith.constant 16 : i32
    %0 = arith.muli %arg0, %c16_i32 : i32
    %c0_i32 = arith.constant 0 : i32
    %c16_i32_0 = arith.constant 16 : i32
    %1 = arith.addi %c0_i32, %c16_i32_0 : i32
    %c1_i32 = arith.constant 1 : i32
    scf.for %arg4 = %c0_i32 to %1 step %c1_i32  : i32 {
      %2 = arith.addi %0, %arg4 : i32
      %3 = arith.index_cast %2 : i32 to index
      %4 = memref.load %arg1[%3] : memref<16xi32, #tpu.memory_space<smem>>
      %5 = arith.index_cast %4 : i32 to index
      %c0 = arith.constant 0 : index
      %6 = vector.load %arg2[%5, %c0] : memref<50x128xf32, #tpu.memory_space<vmem>>, vector<1x128xf32>
      %7 = arith.index_cast %arg4 : i32 to index
      %c0_2 = arith.constant 0 : index
      %8 = vector.load %arg3[%7, %c0_2] : memref<16x128xf32, #tpu.memory_space<vmem>>, vector<1x128xf32>
      tpu.vector_store %arg3[%7, %c0_2], %6 {strides = array<i32>} : memref<16x128xf32, #tpu.memory_space<vmem>>, vector<1x128xf32>,
    }
    %c16_i32_1 = arith.constant 16 : i32
    return
  }
  func.func @transform_0(%arg0: i32, %arg1: memref<16xi32, #tpu.memory_space<smem>>) -> (i32, i32) {
    %c0_i32 = arith.constant 0 : i32
    %c0_i32_0 = arith.constant 0 : i32
    %c0_i32_1 = arith.constant 0 : i32
    return %c0_i32, %c0_i32_0 : i32, i32
  }
  func.func @transform_1(%arg0: i32, %arg1: memref<16xi32, #tpu.memory_space<smem>>) -> (i32, i32) {
    %c0_i32 = arith.constant 0 : i32
    %c0_i32_0 = arith.constant 0 : i32
    return %arg0, %c0_i32 : i32, i32
  }
}

</mosaic_0001>

<bundles_post_ra>
// kernel: tpu_custom_call.1
= control target key start
LH: loop header
LB: loop body
LE: loop exit
PB: predicated region body
PF: predicated region fallthrough
CT: control target
= control target key end

     0   :  { %s140_s9 = smov [#allocation3]   ;;  %s175_s0 = inlined_call_operand.hbm [shape: s32[16], index: 0, kind: input, shape index: {}]   ;;  %s176_s1 = inlined_call_operand.hbm [shape: f32[50,128], index: 1, kind: input, shape index: {}]   ;;  %s177_s2 = inlined_call_operand.hbm [shape: f32[16,128], index: 2, kind: output, shape index: {}]  }
   0x1   :  { %8 = dma.hbm_to_smem %s175_s0, 16, %s140_s9, [#allocation2] }
   0x2   :  { %130 = dma.done.wait [#allocation2], 16 }
   0x3   :  { %131 = vsyncadd [#allocation2], 4294967280 }
   0x4   :  { %10 = sfence }
   0x5   :  { %11 = vsyncpa [#allocation5], 0 }
   0x6   :  { %12 = vsyncpa [#allocation6], 0  ;;  %s141_s12 = smov [#allocation4]  }
   0x7   :  { %s18_s13 = sshll.u32 %s141_s12, 4  ;;  %s19_s13 = int_to_ptr.vmem [resolvable:$true] %s18_s13 }
   0x8   :  { %s94_s14 = scalar_lea.vmem %s19_s13, 896  ;;  %p99_p1 = scmp.lt.s32.totalorder %s19_s13, %s19_s13 }
   0x9   :  { %p95_p0 = scmp.ne.s32.totalorder %s19_s13, %s94_s14  ;;  %p100_p2 = scmp.lt.s32.totalorder %s94_s14, %s94_s14 }
   0xb   :  { %p101_p3 = por %p100_p2, %p99_p1 }
   0xd   :  { %p102_p4 = pnand %p101_p3, %p95_p0 }
   0xf   :  { %105 = shalt.err (!%p102_p4)
}
  0x10   :  { %s142_s15 = smov 128   ;;  %s143_s16 = smov 8  }
  0x11   :  { %24 = dma.hbm_to_vmem [thread:$0]  %s176_s1, 896, %s19_s13, [#allocation5], %s142_s15, %s142_s15, %s143_s16  }
  0x12   :  { %132 = dma.done.wait [#allocation5], 896  }
  0x13   :  { %133 = vsyncadd [#allocation5], 4294966400  ;;  %s136_s18 = smov 0  }
  0x14 LB: > { %s36_s19 = sld [smem:[#allocation3 + %s138_s18]]  ;;  %s39_s21 = scalar_lea.vmem [#allocation7], %s138_s18  ;;  %s138_s18 = sphi %s136_s18, %s34_s18  }
  0x15   : > { %s34_s18 = sadd.s32 1, %s138_s18  }
  0x16   : > { %p31_p5 = scmp.ge.s32.totalorder %s34_s18, 16  }
  0x17   :  { %s144_s22 = smov (%p31_p5), [#allocation7]  }
  0x18   :  { %33 = sbr.rel (!%p31_p5) target bundleno = 20 (0x14), region = 37  ;;  %s46_s23 = sshll.u32 (%p31_p5), %s144_s22, 4  ;;  %s47_s23 = int_to_ptr.vmem [resolvable:$true] %s46_s23 }
  0x19   :  { %s106_s24 = scalar_lea.vmem (%p31_p5), %s47_s23, 256  ;;  %p111_p7 = scmp.lt.s32.totalorder (%p31_p5), %s47_s23, %s47_s23 }
  0x1a   : > { %s37_s20 = scalar_lea.vmem [#allocation4], %s36_s19  ;;  %p107_p6 = scmp.ne.s32.totalorder (%p31_p5), %s47_s23, %s106_s24 }
  0x1b   : > { %v38_v0 = vld [vmem:[%s37_s20] sm:$0x1]  ;;  %p112_p8 = scmp.lt.s32.totalorder (%p31_p5), %s106_s24, %s106_s24 }
  0x1c   : > { %40 = vst [vmem:[%s39_s21] sm:$0x1] %v38_v0 }
  0x1d   :  { %p113_p9 = por %p112_p8, %p111_p7 }
  0x1f   :  { %p114_p10 = pnand %p113_p9, %p107_p6 }
  0x21   :  { %117 = shalt.err (!%p114_p10)
}
  0x22   :  { %52 = dma.vmem_to_hbm [thread:$0]  %s47_s23, 256, %s177_s2, [#allocation6], %s142_s15, %s142_s15, %s143_s16  }
  0x23   :  { %134 = dma.done.wait [#allocation6], 256  }
  0x24   :  { %135 = vsyncadd [#allocation6], 4294967040 }
  0x25   :  { %56 = vsyncpa [#allocation5], 1 }
  0x26   :  { %57 = vsyncpa [#allocation6], 1 }

</bundles_post_ra>
